<compile_context>
chip_gen: v7x
topology: tpu7x:2x2x1
jax: 0.10.0
libtpu: 0.0.40
codegen_flags: <defaults>
</compile_context>

<pallas_src>
import functools

import jax
import jax.numpy as jnp
from jax.experimental import pallas as pl
from jax.experimental.pallas import tpu as pltpu


# ----------------------------------------------------------------------------
# helpers
# ----------------------------------------------------------------------------
def _round_up(x, m):
    return ((x + m - 1) // m) * m


def _largest_divisor(n, limit, quantum, floor):
    """Largest t <= limit with t % quantum == 0 and n % t == 0 (floor is a
    caller-guaranteed divisor used as a last resort)."""
    t = (min(limit, n) // quantum) * quantum
    while t >= quantum:
        if n % t == 0:
            return t
        t -= quantum
    return floor


def _tpu_vmem_capacity():
    try:
        return int(pltpu.get_tpu_info().vmem_capacity_bytes)
    except Exception:
        return 64 * 1024 * 1024  # conservative (v7x per-TC capacity)


def _vmem_limit(footprint_bytes):
    """Scoped-VMEM budget: actual tile footprint + headroom, clamped to chip."""
    cap = _tpu_vmem_capacity()
    want = footprint_bytes * 2 + (8 << 20)      # pipeline slack + Mosaic scratch
    floor = min(32 << 20, cap // 2)
    return int(min(cap * 9 // 10, max(want, floor)))


def _plan_tiles(n):
    """Return (n_pad, tile_n, tile_k) for the aggregation grid.

    * n_pad: zero-padded node count so the tiles always divide it exactly
      (never falls back to an (N, N) block for awkward/prime N).
    * tile_n: multiple of 16 (bf16-native sublane tiling), and there are
      always >= 2 row tiles so the v7x megacore 'parallel' axis has work for
      both TensorCores.
    * tile_k: targets 2048 (or the whole padded dim when small) to amortize
      per-grid-step overhead and the accumulator read-modify-write.
    """
    if n <= 2048:
        n_pad = _round_up(max(n, 32), 32)
        tile_n = n_pad // 2          # multiple of 16, exactly 2 row tiles
        tile_k = n_pad               # single K step (full-dim block is legal)
    else:
        n_pad = _round_up(n, 256)    # <= ~25% pad overhead right above 2048,
        tile_k = _largest_divisor(n_pad, limit=2048, quantum=128, floor=256)
        tile_n = _largest_divisor(n_pad, limit=min(1024, n_pad // 2),
                                  quantum=16, floor=256)
    return n_pad, tile_n, tile_k


# ----------------------------------------------------------------------------
# kernel 1: per-layer feature transform  XW = X @ W   (computed once per layer)
# ----------------------------------------------------------------------------
def _xw_kernel(x_ref, w_ref, o_ref):
    o_ref[...] = jnp.dot(
        x_ref[...], w_ref[...], preferred_element_type=jnp.float32
    ).astype(o_ref.dtype)


def feature_transform(x, w_p, *, tile_n):
    n, f_in = x.shape
    fp = w_p.shape[1]
    footprint = (2 * tile_n * f_in * x.dtype.itemsize
                 + 2 * f_in * fp * w_p.dtype.itemsize
                 + 2 * tile_n * fp * 2)
    return pl.pallas_call(
        _xw_kernel,
        out_shape=jax.ShapeDtypeStruct((n, fp), jnp.bfloat16),
        grid_spec=pltpu.PrefetchScalarGridSpec(
            num_scalar_prefetch=0,
            grid=(n // tile_n,),
            in_specs=[
                pl.BlockSpec((tile_n, f_in), lambda i: (i, 0)),  # X row tile
                pl.BlockSpec((f_in, fp), lambda i: (0, 0)),      # full W
            ],
            out_specs=pl.BlockSpec((tile_n, fp), lambda i: (i, 0)),
        ),
        compiler_params=pltpu.CompilerParams(
            dimension_semantics=("parallel",),
            vmem_limit_bytes=_vmem_limit(footprint),
        ),
    )(x, w_p)


# ----------------------------------------------------------------------------
# kernel 2: aggregation  Y = A_hat @ XW + b  (+ optional exact GELU)
#   grid = (row tiles, K tiles over nodes); f32 accumulator in VMEM scratch.
#   XW is either fully VMEM-resident (loaded once; sliced per K step) or
#   streamed per K tile.
# ----------------------------------------------------------------------------
def _agg_kernel(a_ref, xw_ref, b_ref, o_ref, acc_ref, *, apply_act,
                xw_resident, tile_k):
    k = pl.program_id(1)

    @pl.when(k == 0)
    def _():
        acc_ref[...] = jnp.zeros_like(acc_ref)

    if xw_resident:
        start = pl.multiple_of(k * tile_k, tile_k)
        xw = xw_ref[pl.ds(start, tile_k), :]
    else:
        xw = xw_ref[...]

    acc_ref[...] += jnp.dot(a_ref[...], xw, preferred_element_type=jnp.float32)

    @pl.when(k == pl.num_programs(1) - 1)
    def _():
        y = acc_ref[...] + b_ref[...]
        if apply_act:
            # F.gelu default is the exact (erf-based) GELU.
            y = jax.nn.gelu(y, approximate=False)
        o_ref[...] = y.astype(o_ref.dtype)


def aggregate(a_p, xw, b_p, *, apply_act, out_dtype, tile_n, tile_k,
              xw_resident):
    n = a_p.shape[0]
    fp = xw.shape[1]

    if xw_resident:
        xw_spec = pl.BlockSpec((n, fp), lambda i, k: (0, 0))   # loaded once
        xw_bytes = 2 * n * fp * 2
    else:
        xw_spec = pl.BlockSpec((tile_k, fp), lambda i, k: (k, 0))
        xw_bytes = 2 * tile_k * fp * 2

    footprint = (2 * tile_n * tile_k * a_p.dtype.itemsize   # A (double-buffered)
                 + xw_bytes                                  # XW
                 + 2 * 8 * fp * 4                            # bias (padded)
                 + tile_n * fp * 4                           # f32 accumulator
                 + 2 * tile_n * fp * jnp.dtype(out_dtype).itemsize)

    kernel = functools.partial(_agg_kernel, apply_act=apply_act,
                               xw_resident=xw_resident, tile_k=tile_k)
    return pl.pallas_call(
        kernel,
        out_shape=jax.ShapeDtypeStruct((n, fp), out_dtype),
        grid_spec=pltpu.PrefetchScalarGridSpec(
            num_scalar_prefetch=0,
            grid=(n // tile_n, n // tile_k),
            in_specs=[
                pl.BlockSpec((tile_n, tile_k), lambda i, k: (i, k)),  # A tile
                xw_spec,                                              # XW
                pl.BlockSpec((1, fp), lambda i, k: (0, 0)),           # bias
            ],
            out_specs=pl.BlockSpec((tile_n, fp), lambda i, k: (i, 0)),
            scratch_shapes=[pltpu.VMEM((tile_n, fp), jnp.float32)],
        ),
        compiler_params=pltpu.CompilerParams(
            dimension_semantics=("parallel", "arbitrary"),
            vmem_limit_bytes=_vmem_limit(footprint),
        ),
    )(a_p, xw, b_p)


# ----------------------------------------------------------------------------
# forward pass
# ----------------------------------------------------------------------------
def gcn_forward(x, a_hat, weights, biases):
    """GCN forward (act=gelu, norm=None, jk=None, dropout=0.0). Returns f32."""
    num_layers = len(weights)
    n = x.shape[0]
    assert a_hat.shape == (n, n)

    n_pad, tile_n, tile_k = _plan_tiles(n)
    cap = _tpu_vmem_capacity()
    f_out_final = weights[-1].shape[1]

    # Zero-pad the node dimension (padded rows/cols of A_hat are zero, so the
    # real rows of every layer's output are unaffected).
    a_p = jnp.zeros((n_pad, n_pad), jnp.bfloat16).at[:n, :n].set(
        a_hat.astype(jnp.bfloat16))

    # Keep the full XW slab resident in VMEM (loaded once, no per-row-tile
    # re-stream) whenever it comfortably fits a conservative budget.
    fp_max = max(_round_up(w.shape[1], 128) for w in weights)
    xw_resident = (2 * n_pad * fp_max * 2) <= min(16 << 20, cap // 4)

    # bf16 activations end-to-end (including the first layer's X); matmul
    # accumulation stays f32 via preferred_element_type.
    h = jnp.zeros((n_pad, x.shape[1]), jnp.bfloat16).at[:n].set(
        x.astype(jnp.bfloat16))

    for i, (w, b) in enumerate(zip(weights, biases)):
        f_in, f_out = w.shape
        fp = _round_up(f_out, 128)       # lane-dense (padded) feature width
        assert h.shape[1] >= f_in

        # Zero-pad W rows to the (padded) current width and cols to fp.
        w_p = jnp.zeros((h.shape[1], fp), jnp.float32).at[:f_in, :f_out].set(w)
        w_p = w_p.astype(jnp.bfloat16)
        b_p = jnp.zeros((1, fp), jnp.float32).at[:, :f_out].set(
            jnp.asarray(b, jnp.float32).reshape(1, -1))

        last = i == num_layers - 1
        xw = feature_transform(h, w_p, tile_n=tile_n)
        h = aggregate(
            a_p, xw, b_p,
            apply_act=not last,                       # last layer: no act
            out_dtype=jnp.float32 if last else jnp.bfloat16,
            tile_n=tile_n, tile_k=tile_k, xw_resident=xw_resident,
        )
        # dropout(p=0.0) is a no-op; norms is None; no jk.

    return h[:n, :f_out_final]


# ----------------------------------------------------------------------------
# glue: dense normalized adjacency from edge_index (matches PyG gcn_norm)
# ----------------------------------------------------------------------------
def build_normalized_adjacency(edge_index, num_nodes):
    """Dense D^{-1/2}(A + remaining self-loops)D^{-1/2} from [2, E] edge_index.

    Follows PyG GCNConv defaults: directed edges (flow source->target, no
    symmetrization), add_remaining_self_loops (no double-counting of existing
    self-loop edges), degree from the destination scatter.
    """
    src, dst = edge_index[0], edge_index[1]
    a = jnp.zeros((num_nodes, num_nodes), jnp.float32)
    a = a.at[dst, src].add(1.0)                      # A[i, j]: message j -> i
    has_self = jnp.diag(a) > 0.0
    a = a + jnp.diag(jnp.where(has_self, 0.0, 1.0))  # remaining self-loops only
    deg = jnp.sum(a, axis=1)                         # == scatter over dst
    d_inv_sqrt = jnp.where(deg > 0, 1.0 / jnp.sqrt(deg), 0.0)
    return a * d_inv_sqrt[:, None] * d_inv_sqrt[None, :]


def glorot(key, shape):
    fan_in, fan_out = shape
    limit = jnp.sqrt(6.0 / (fan_in + fan_out))
    return jax.random.uniform(key, shape, jnp.float32, -limit, limit)


def gcn_reference(x, a_hat, weights, biases):
    """Pure-JAX f32 reference for the same forward pass."""
    h = x
    num_layers = len(weights)
    for i, (w, b) in enumerate(zip(weights, biases)):
        h = a_hat @ (h @ w) + b.reshape(1, -1)
        if i != num_layers - 1:
            h = jax.nn.gelu(h, approximate=False)
    return h


if __name__ == "__main__":
    # GCN(in_channels=16, hidden_channels=32, num_layers=2, out_channels=8,
    #     act=gelu, norm=None, jk=None, dropout=0.0)
    N, F_IN, HIDDEN, F_OUT, NUM_LAYERS = 64, 16, 32, 8, 2

    key = jax.random.PRNGKey(0)
    kx, ke, kw0, kw1 = jax.random.split(key, 4)

    x = jax.random.normal(kx, (N, F_IN), jnp.float32)

    # Deterministic random edge_index [2, E]
    E = 256
    edge_index = jax.random.randint(ke, (2, E), 0, N, dtype=jnp.int32)
    a_hat = build_normalized_adjacency(edge_index, N)

    # Layer parameters (GCNConv: glorot weight, zero bias)
    weights = [glorot(kw0, (F_IN, HIDDEN)), glorot(kw1, (HIDDEN, F_OUT))]
    biases = [jnp.zeros((1, HIDDEN), jnp.float32),
              jnp.zeros((1, F_OUT), jnp.float32)]
    assert len(weights) == NUM_LAYERS

    out = gcn_forward(x, a_hat, weights, biases)
    out = jax.block_until_ready(out)

    assert out.shape == (N, F_OUT)
    assert bool(jnp.all(jnp.isfinite(out)))

    # Numerical check against the pure-f32 reference (bf16 A_hat / activations
    # in the kernel path -> generous tolerance).
    ref = gcn_reference(x, a_hat, weights, biases)
    assert bool(jnp.allclose(out, ref, atol=5e-2, rtol=5e-2)), (
        float(jnp.max(jnp.abs(out - ref))))

    print("KERNEL_OK")
</pallas_src>

<mosaic_0001>
module attributes {stable_mosaic.version = 11 : i64} {
  func.func @_xw_kernel(%arg0: i32, %arg1: memref<32x16xbf16, #tpu.memory_space<vmem>>, %arg2: memref<16x128xbf16, #tpu.memory_space<vmem>>, %arg3: memref<32x128xbf16, #tpu.memory_space<vmem>>) attributes {dimension_semantics = [#tpu.dimension_semantics<parallel>], iteration_bounds = array<i64: 2>, scalar_prefetch = 0 : i64, scratch_operands = 0 : i64, tpu.core_type = #tpu.core_type<tc>, window_params = [{transform_indices = @transform_0, window_bounds = array<i64: 32, 16>}, {pipeline_mode = #tpu.pipeline_mode<synchronous>, transform_indices = @transform_1, window_bounds = array<i64: 16, 128>}, {transform_indices = @transform_2, window_bounds = array<i64: 32, 128>}]} {
    %c0 = arith.constant 0 : index
    %c0_0 = arith.constant 0 : index
    %0 = vector.load %arg1[%c0, %c0_0] : memref<32x16xbf16, #tpu.memory_space<vmem>>, vector<32x16xbf16>
    %c0_1 = arith.constant 0 : index
    %c0_2 = arith.constant 0 : index
    %1 = vector.load %arg2[%c0_1, %c0_2] : memref<16x128xbf16, #tpu.memory_space<vmem>>, vector<16x128xbf16>
    %cst = arith.constant dense<0.000000e+00> : vector<32x128xf32>
    %2 = tpu.matmul %0, %1, %cst {dimension_numbers = #tpu.dot_dimension_numbers<[1], [0], [0], [1], [0, 0, 1, 1], [], []>} : vector<32x16xbf16>, vector<16x128xbf16>, vector<32x128xf32> -> vector<32x128xf32>
    %3 = arith.truncf %2 : vector<32x128xf32> to vector<32x128xbf16>
    %c0_3 = arith.constant 0 : index
    %c0_4 = arith.constant 0 : index
    %4 = vector.load %arg3[%c0_3, %c0_4] : memref<32x128xbf16, #tpu.memory_space<vmem>>, vector<32x128xbf16>
    tpu.vector_store %arg3[%c0_3, %c0_4], %3 {strides = array<i32>} : memref<32x128xbf16, #tpu.memory_space<vmem>>, vector<32x128xbf16>,
    return
  }
  func.func @transform_0(%arg0: i32) -> (i32, i32) {
    %c0_i32 = arith.constant 0 : i32
    %c0_i32_0 = arith.constant 0 : i32
    return %arg0, %c0_i32 : i32, i32
  }
  func.func @transform_1(%arg0: i32) -> (i32, i32) {
    %c0_i32 = arith.constant 0 : i32
    %c0_i32_0 = arith.constant 0 : i32
    %c0_i32_1 = arith.constant 0 : i32
    return %c0_i32, %c0_i32_0 : i32, i32
  }
  func.func @transform_2(%arg0: i32) -> (i32, i32) {
    %c0_i32 = arith.constant 0 : i32
    %c0_i32_0 = arith.constant 0 : i32
    return %arg0, %c0_i32 : i32, i32
  }
}

</mosaic_0001>

<bundles_post_ra>
// kernel: tpu_custom_call.1
= control target key start
LH: loop header
LB: loop body
LE: loop exit
PB: predicated region body
PF: predicated region fallthrough
CT: control target
= control target key end

     0   :  { %7 = vsyncpa [#allocation3], 0  ;;  %s597_s0 = inlined_call_operand.vmem [shape: bf16[64,16], index: 0, kind: input, shape index: {}]   ;;  %s598_s1 = inlined_call_operand.vmem [shape: bf16[16,128], index: 1, kind: input, shape index: {}]   ;;  %s599_s2 = inlined_call_operand.hbm [shape: bf16[64,128], index: 2, kind: output, shape index: {}]  }
   0x1   :  { %9 = vsyncpa [#allocation3 + $0x1], 0  ;;  %s492_s9 = smov 0   ;;  %s494_s10 = smov 0  }
   0x2   :  { %s496_s11 = smov 0   ;;  %s498_s12 = smov 0  }
   0x3 LB: > { %s513_s13 = sadd.s32 4294967295, %s472_s12   ;;  %s320_s14 = sadd.s32 4294967294, %s472_s12   ;;  %s472_s12 = sphi %s498_s12, %s605_s12   ;;  %s468_s11 = sphi %s496_s11, %s604_s11   ;;  %s464_s10 = sphi %s494_s10, %s603_s10   ;;  %s460_s9 = sphi %s492_s9, %s602_s9  }
   0x4   : > { %s517_s15 = sadd.s32 1, %s472_s12   ;;  %s69_s16 = sadd.s32 1, %s468_s11 }
   0x5   : > { %s66_s17 = ssub.s32 %s472_s12, %s517_s15  ;;  %p79_p0 = scmp.ne.s32.totalorder %s468_s11, %s464_s10 }
   0x6   : > { %p67_p1 = scmp.eq.s32.totalorder %s66_s17, 0  ;;  %p80_p2 = scmp.eq.s32.totalorder %s513_s13, 1 }
   0x7   : > { %p85_p3 = scmp.ne.s32.totalorder %s464_s10, %s460_s9  ;;  %p86_p4 = scmp.eq.s32.totalorder %s320_s14, 1 }
   0x8   : > { %s528_s18 = scalar_select %p67_p1, %s468_s11, %s69_s16  }
   0x9   : > { %p530_p5 = por %p80_p2, %p79_p0  ;;  %p534_p6 = por %p86_p4, %p85_p3 }
   0xa   : > { %p323_p7 = scmp.ge.s32.totalorder %s472_s12, 1  ;;  %p116_p8 = scmp.lt.s32.totalorder %s472_s12, 3 }
   0xc   : > { %p117_p9 = pnand %p323_p7, %p116_p8 }
   0xd   : > { %v407_v0 = vld [vmem:[%s598_s1] sm:$0xff] (!%p117_p9)   ;;  %s325_s23 = sshll.u32 (!%p117_p9), %s513_s13, 2  ;;  %vm168_vm0 = vcmask (!%p117_p9), 130048   ;;  %s135_s28 = sand.u32 (!%p117_p9), 1, %s464_s10  }
   0xe   : > { %120 = sbr.rel (%p117_p9) target bundleno = 258 (0x102), region = 28  ;;  %p139_p10 = scmp.lt.s32.totalorder (!%p117_p9), %s325_s23, 7  ;;  %360 = vmatprep.subr.bf16.mxu0 (!%p117_p9), %v407_v0 }
   0xf   : > { %361 = vmatpush3.bf16.msra.mxu0 (!%p117_p9), %v407_v0  ;;  %s324_s29 = sshll.u32 (!%p117_p9), %s135_s28, 4  ;;  %s345_s4 = sshll.u32 (!%p117_p9), %s513_s13, 8 }
  0x10   : > { %s137_s30 = scalar_lea.vmem (!%p117_p9), [#allocation2], %s324_s29  ;;  %s554_s7 = scalar_lea.hbm (!%p117_p9), %s599_s2, %s345_s4 }
  0x11   : > { %s258_s3 = sshll.u32 (!%p117_p9), %s137_s30, 4  ;;  %s556_s8 = scalar_lea.sflag (!%p117_p9), [#allocation3], %s135_s28  ;;  %s549_s3 = int_to_ptr.vmem [resolvable:$true] %s258_s3 }
  0x12   : > { %s410_s13 = scalar_lea.vmem (!%p117_p9), %s549_s3, 256  ;;  %s474_s14 = smov (!%p117_p9), [#allocation2]  }
  0x13   : > { %p411_p11 = scmp.ne.s32.totalorder (!%p117_p9), %s549_s3, %s410_s13  ;;  %s414_s16 = sshll.u32 (!%p117_p9), %s474_s14, 4  ;;  %s415_s16 = int_to_ptr.vmem [resolvable:$false] %s414_s16 }
  0x14   : > { %s416_s17 = scalar_lea.vmem (!%p117_p9), %s415_s16, 512  ;;  %p417_p0 = scmp.lt.s32.totalorder (!%p117_p9), %s549_s3, %s415_s16 }
  0x15   : > { %s607_s23 = smov (!%p139_p10, %s325_s23), 7  ;;  %p412_p12 = pnand %p411_p11, %p530_p5 }
  0x16   : > { %s326_s24 = sshll.u32 %s607_s23, 2  ;;  %p418_p1 = scmp.lt.s32.totalorder %s416_s17, %s410_s13 }
  0x17   : > { %s142_s27 = scalar_lea.vmem %s597_s0, %s326_s24  ;;  %p413_p13 = pneg %p412_p12 }
  0x18   : > { %v408_v1 = vld [vmem:[%s142_s27] sm:$0xff]   ;;  %v409_v2 = vld [vmem:[%s142_s27 + $0x8] sm:$0xff]   ;;  %p419_p2 = por %p418_p1, %p417_p0 }
  0x19   : > { %362 = vmatprep.mubr.msk.bf16.mxu0 %vm168_vm0, %v408_v1 }
  0x1a   : > { %363 = vmatmul.mubr.msk.bf16.vlgmr.msra.gmra.mrb[0].mxu0 %vm168_vm0, %v409_v2  ;;  %p420_p3 = pnand %p419_p2, %p413_p13 }
  0xed   : > { %v364_v3 = vpop.f32.mrb[0].mxu0 }
  0xee   : > { %v209_v4 = vpop.f32.mrb[1].mxu0 }
  0xef   : > { %v365_v5 = vpop.f32.mrb[2].mxu0 }
  0xf0   : > { %v354_v6 = vpack.c.bf16 %v365_v5, %v364_v3  ;;  %v212_v7 = vpop.f32.mrb[3].mxu0 }
  0xf1   : > { %v349_v8 = vpack.c.bf16 %v212_v7, %v209_v4 }
  0xf2   : > { %356 = vst [vmem:[%s137_s30 + $0x8] sm:$0xff] %v354_v6  }
  0xf3   : > { %350 = vst [vmem:[%s137_s30] sm:$0xff] %v349_v8  }
  0xf4   : > { %423 = shalt.err (!%p420_p3)
}
  0xf5   : > { %s424_s21 = scalar_lea.hbm %s554_s7, 256  ;;  %s428_s24 = scalar_lea.hbm %s599_s2, 512 }
  0xf6   : > { %p425_p4 = scmp.ne.s32.totalorder %s554_s7, %s424_s21  ;;  %p429_p9 = scmp.lt.u32.totalorder %s554_s7, %s599_s2 }
  0xf7   : > { %p430_p10 = scmp.lt.u32.totalorder %s428_s24, %s424_s21  ;;  %p432_p12 = scmp.lt.u32.totalorder %s424_s21, %s554_s7 }
  0xf8   : > { %p426_p7 = pnand %p425_p4, %p530_p5 }
  0xf9   : > { %p431_p11 = por %p430_p10, %p429_p9 }
  0xfa   : > { %p427_p8 = pneg %p426_p7 }
  0xfb   : > { %p433_p13 = por %p432_p12, %p431_p11 }
  0xfd   : > { %p434_p0 = pnand %p433_p13, %p427_p8 }
  0xff   : > { %437 = shalt.err (!%p434_p0)
}
 0x100   : > { %s475_s27 = smov 64   ;;  %s476_s28 = smov 4  }
 0x101   : > { %366 = dma.vmem_to_hbm [thread:$0]  (%p530_p5), %s549_s3, 256, %s554_s7, %s556_s8, %s475_s27, %s475_s27, %s476_s28  }
 0x102 PF: > { %p372_p1 = scmp.ge.s32.totalorder %s472_s12, 2  ;;  %s273_s29 = sand.u32 1, %s460_s9  }
 0x103   : > { %s274_s30 = scalar_lea.sflag [#allocation3], %s273_s29 }
 0x104   : > { %p369_p2 = pnand %p372_p1, %p534_p6 }
 0x106   : > { %455 = dma.done.wait (!%p369_p2), %s274_s30, 256  }
 0x107   : > { %457 = vsyncadd (!%p369_p2), %s274_s30, 4294967040  ;;  %p12_p3 = scmp.ge.s32.totalorder %s517_s15, 4   ;;  %s602_s9 = smov %s464_s10 }
 0x108   : > { %s603_s10 = smov %s468_s11  ;;  %s604_s11 = smov %s528_s18 }
 0x109   : > { %s605_s12 = smov %s517_s15  ;;  %14 = sbr.rel (!%p12_p3) target bundleno = 3 (0x3), region = 63 }
 0x110   :  { %279 = vsyncpa [#allocation3], 1 }
 0x111   :  { %281 = vsyncpa [#allocation3 + $0x1], 1 }

</bundles_post_ra>
